<compile_context>
chip_gen: v5e
topology: v5e:2x2
jax: 0.10.0
libtpu: 0.0.40
codegen_flags: <defaults>
</compile_context>

<pallas_src>
import jax
import jax.numpy as jnp
from jax.experimental import pallas as pl
from jax.experimental.pallas import tpu as pltpu

LEAKY_SLOPE = 0.01
DROP_P = 0.3
# (in_features, out_features) for the 8 dense layers of MLPwithARD(19 -> 3)
LAYER_DIMS = [(19, 64), (64, 64), (64, 64), (64, 32),
              (32, 32), (32, 32), (32, 16), (16, 3)]
N_LAYERS = len(LAYER_DIMS)
HIDDEN_WIDTHS = [d[1] for d in LAYER_DIMS[:-1]]  # layers followed by dropout


def ard_mlp_kernel(feat_ref, x_ref, *refs):
    """refs = 7 dropout-mask refs, 16 weight/bias refs, then the output ref."""
    mask_refs = refs[:N_LAYERS - 1]
    wb_refs = refs[N_LAYERS - 1:-1]
    out_ref = refs[-1]

    h = feat_ref[...]  # (TILE_N, 19) f32
    for li in range(N_LAYERS):
        w = wb_refs[2 * li][...]        # (in, out)  (scale folded in for li>0)
        b = wb_refs[2 * li + 1][...]    # (1, out)
        h = jnp.dot(h, w, preferred_element_type=jnp.float32) + b
        if li < N_LAYERS - 1:
            # Fused LeakyReLU + MC-dropout keep-mask (scale already folded
            # into the next layer's weights).
            act = jnp.where(h >= 0.0, h, jnp.float32(LEAKY_SLOPE) * h)
            h = act * mask_refs[li][...]

    # h: (TILE_N, 3) -> A, B, m columns
    A = h[:, 0:1]
    B = h[:, 1:2]
    m = h[:, 2:3]
    xc = jnp.maximum(x_ref[...], jnp.float32(1e-10))  # (TILE_N, 1)
    out_ref[...] = A * jnp.exp(B * jnp.log(xc)) + m   # A * x**B + m


def build_params(key, alpha_list):
    """Deterministic parameter construction mirroring the module __init__."""
    params = []
    # GaussianPriorLayer(19, 64): weights_mean = 0, bias = 0; sample weights.
    key, k0 = jax.random.split(key)
    weights_mean = jnp.zeros((19, 64), jnp.float32)
    std = jnp.sqrt(alpha_list)[:, None]                       # (19, 1)
    w0 = weights_mean + std * jax.random.normal(k0, (19, 64), jnp.float32)
    b0 = jnp.zeros((64,), jnp.float32)
    params.append((w0, b0))
    # The 7 plain nn.Linear layers (uniform init with fan-in bound).
    for fi, fo in LAYER_DIMS[1:]:
        key, kw, kb = jax.random.split(key, 3)
        bound = 1.0 / jnp.sqrt(jnp.float32(fi))
        w = jax.random.uniform(kw, (fi, fo), jnp.float32, -bound, bound)
        b = jax.random.uniform(kb, (fo,), jnp.float32, -bound, bound)
        params.append((w, b))
    return params


def _round_up(a, b):
    return (a + b - 1) // b * b


def combined_model_forward(features, x, params, dropout_key, *, tile_n=512):
    n = features.shape[0]
    tile = tile_n if n >= tile_n else _round_up(max(n, 1), 8)
    n_pad = _round_up(n, tile)
    num_tiles = n_pad // tile

    feat = jnp.zeros((n_pad, 19), jnp.float32)
    feat = feat.at[:n].set(features.astype(jnp.float32))
    xp = jnp.ones((n_pad, 1), jnp.float32)
    xp = xp.at[:n, 0].set(x.astype(jnp.float32))

    # MC-dropout keep masks (always on). keep prob = 1 - p.  The 1/(1-p)
    # inverted-dropout scale is folded into the next layer's weights below.
    mask_keys = jax.random.split(dropout_key, len(HIDDEN_WIDTHS))
    masks = [
        jax.random.bernoulli(mask_keys[i], 1.0 - DROP_P, (n_pad, w)).astype(jnp.float32)
        for i, w in enumerate(HIDDEN_WIDTHS)
    ]

    scale = jnp.float32(1.0 / (1.0 - DROP_P))
    flat = []
    for li, (w, b) in enumerate(params):
        w = w.astype(jnp.float32)
        if li > 0:
            w = w * scale  # fold inverted-dropout scale of the preceding dropout
        flat.append(w)
        flat.append(b.reshape(1, -1).astype(jnp.float32))

    in_specs = [
        pl.BlockSpec((tile, 19), lambda i: (i, 0)),   # features tile
        pl.BlockSpec((tile, 1), lambda i: (i, 0)),    # x tile
    ]
    in_specs += [pl.BlockSpec((tile, w), lambda i: (i, 0)) for w in HIDDEN_WIDTHS]
    # Weights/biases: full-shape blocks with constant index maps -> VMEM-resident.
    in_specs += [pl.BlockSpec(arr.shape, lambda i: (0, 0)) for arr in flat]

    out = pl.pallas_call(
        ard_mlp_kernel,
        grid=(num_tiles,),
        out_shape=jax.ShapeDtypeStruct((n_pad, 1), jnp.float32),
        in_specs=in_specs,
        out_specs=pl.BlockSpec((tile, 1), lambda i: (i, 0)),
        compiler_params=pltpu.CompilerParams(dimension_semantics=("parallel",)),
    )(feat, xp, *masks, *flat)
    return out[:n, 0]


if __name__ == "__main__":
    key = jax.random.PRNGKey(0)
    k_alpha, k_feat, k_x, k_params, k_drop = jax.random.split(key, 5)

    N = 8
    alpha_list = jax.random.uniform(k_alpha, (19,), jnp.float32, 0.1, 1.0)
    features = jax.random.normal(k_feat, (N, 19), jnp.float32)
    x = jax.random.uniform(k_x, (N,), jnp.float32, 0.5, 2.0)

    params = build_params(k_params, alpha_list)

    out = combined_model_forward(features, x, params, k_drop)
    jax.block_until_ready(out)
    assert out.shape == (N,)
    assert bool(jnp.all(jnp.isfinite(out)))
    print("KERNEL_OK")
</pallas_src>

<mosaic_0001>
module attributes {stable_mosaic.version = 11 : i64} {
  func.func @ard_mlp_kernel(%arg0: i32, %arg1: memref<8x19xf32, #tpu.memory_space<vmem>>, %arg2: memref<8x1xf32, #tpu.memory_space<vmem>>, %arg3: memref<8x64xf32, #tpu.memory_space<vmem>>, %arg4: memref<8x64xf32, #tpu.memory_space<vmem>>, %arg5: memref<8x64xf32, #tpu.memory_space<vmem>>, %arg6: memref<8x32xf32, #tpu.memory_space<vmem>>, %arg7: memref<8x32xf32, #tpu.memory_space<vmem>>, %arg8: memref<8x32xf32, #tpu.memory_space<vmem>>, %arg9: memref<8x16xf32, #tpu.memory_space<vmem>>, %arg10: memref<19x64xf32, #tpu.memory_space<vmem>>, %arg11: memref<1x64xf32, #tpu.memory_space<vmem>>, %arg12: memref<64x64xf32, #tpu.memory_space<vmem>>, %arg13: memref<1x64xf32, #tpu.memory_space<vmem>>, %arg14: memref<64x64xf32, #tpu.memory_space<vmem>>, %arg15: memref<1x64xf32, #tpu.memory_space<vmem>>, %arg16: memref<64x32xf32, #tpu.memory_space<vmem>>, %arg17: memref<1x32xf32, #tpu.memory_space<vmem>>, %arg18: memref<32x32xf32, #tpu.memory_space<vmem>>, %arg19: memref<1x32xf32, #tpu.memory_space<vmem>>, %arg20: memref<32x32xf32, #tpu.memory_space<vmem>>, %arg21: memref<1x32xf32, #tpu.memory_space<vmem>>, %arg22: memref<32x16xf32, #tpu.memory_space<vmem>>, %arg23: memref<1x16xf32, #tpu.memory_space<vmem>>, %arg24: memref<16x3xf32, #tpu.memory_space<vmem>>, %arg25: memref<1x3xf32, #tpu.memory_space<vmem>>, %arg26: memref<8x1xf32, #tpu.memory_space<vmem>>) attributes {dimension_semantics = [#tpu.dimension_semantics<parallel>], iteration_bounds = array<i64: 1>, scalar_prefetch = 0 : i64, scratch_operands = 0 : i64, tpu.core_type = #tpu.core_type<tc>, window_params = [{transform_indices = @transform_0, window_bounds = array<i64: 8, 19>}, {transform_indices = @transform_1, window_bounds = array<i64: 8, 1>}, {transform_indices = @transform_2, window_bounds = array<i64: 8, 64>}, {transform_indices = @transform_3, window_bounds = array<i64: 8, 64>}, {transform_indices = @transform_4, window_bounds = array<i64: 8, 64>}, {transform_indices = @transform_5, window_bounds = array<i64: 8, 32>}, {transform_indices = @transform_6, window_bounds = array<i64: 8, 32>}, {transform_indices = @transform_7, window_bounds = array<i64: 8, 32>}, {transform_indices = @transform_8, window_bounds = array<i64: 8, 16>}, {pipeline_mode = #tpu.pipeline_mode<synchronous>, transform_indices = @transform_9, window_bounds = array<i64: 19, 64>}, {pipeline_mode = #tpu.pipeline_mode<synchronous>, transform_indices = @transform_10, window_bounds = array<i64: 1, 64>}, {pipeline_mode = #tpu.pipeline_mode<synchronous>, transform_indices = @transform_11, window_bounds = array<i64: 64, 64>}, {pipeline_mode = #tpu.pipeline_mode<synchronous>, transform_indices = @transform_12, window_bounds = array<i64: 1, 64>}, {pipeline_mode = #tpu.pipeline_mode<synchronous>, transform_indices = @transform_13, window_bounds = array<i64: 64, 64>}, {pipeline_mode = #tpu.pipeline_mode<synchronous>, transform_indices = @transform_14, window_bounds = array<i64: 1, 64>}, {pipeline_mode = #tpu.pipeline_mode<synchronous>, transform_indices = @transform_15, window_bounds = array<i64: 64, 32>}, {pipeline_mode = #tpu.pipeline_mode<synchronous>, transform_indices = @transform_16, window_bounds = array<i64: 1, 32>}, {pipeline_mode = #tpu.pipeline_mode<synchronous>, transform_indices = @transform_17, window_bounds = array<i64: 32, 32>}, {pipeline_mode = #tpu.pipeline_mode<synchronous>, transform_indices = @transform_18, window_bounds = array<i64: 1, 32>}, {pipeline_mode = #tpu.pipeline_mode<synchronous>, transform_indices = @transform_19, window_bounds = array<i64: 32, 32>}, {pipeline_mode = #tpu.pipeline_mode<synchronous>, transform_indices = @transform_20, window_bounds = array<i64: 1, 32>}, {pipeline_mode = #tpu.pipeline_mode<synchronous>, transform_indices = @transform_21, window_bounds = array<i64: 32, 16>}, {pipeline_mode = #tpu.pipeline_mode<synchronous>, transform_indices = @transform_22, window_bounds = array<i64: 1, 16>}, {pipeline_mode = #tpu.pipeline_mode<synchronous>, transform_indices = @transform_23, window_bounds = array<i64: 16, 3>}, {pipeline_mode = #tpu.pipeline_mode<synchronous>, transform_indices = @transform_24, window_bounds = array<i64: 1, 3>}, {transform_indices = @transform_25, window_bounds = array<i64: 8, 1>}]} {
    %c0 = arith.constant 0 : index
    %c0_0 = arith.constant 0 : index
    %0 = vector.load %arg1[%c0, %c0_0] : memref<8x19xf32, #tpu.memory_space<vmem>>, vector<8x19xf32>
    %c0_1 = arith.constant 0 : index
    %c0_2 = arith.constant 0 : index
    %1 = vector.load %arg10[%c0_1, %c0_2] : memref<19x64xf32, #tpu.memory_space<vmem>>, vector<19x64xf32>
    %c0_3 = arith.constant 0 : index
    %c0_4 = arith.constant 0 : index
    %2 = vector.load %arg11[%c0_3, %c0_4] : memref<1x64xf32, #tpu.memory_space<vmem>>, vector<1x64xf32>
    %cst = arith.constant dense<0.000000e+00> : vector<8x64xf32>
    %3 = tpu.matmul %0, %1, %cst {dimension_numbers = #tpu.dot_dimension_numbers<[1], [0], [0], [1], [0, 0, 1, 1], [], []>} : vector<8x19xf32>, vector<19x64xf32>, vector<8x64xf32> -> vector<8x64xf32>
    %4 = vector.broadcast %2 : vector<1x64xf32> to vector<8x64xf32>
    %5 = arith.addf %3, %4 : vector<8x64xf32>
    %cst_5 = arith.constant 0.000000e+00 : f32
    %6 = vector.broadcast %cst_5 : f32 to vector<8x64xf32>
    %7 = arith.cmpf oge, %5, %6 : vector<8x64xf32>
    %cst_6 = arith.constant 0.00999999977 : f32
    %8 = vector.broadcast %cst_6 : f32 to vector<8x64xf32>
    %9 = arith.mulf %8, %5 : vector<8x64xf32>
    %10 = arith.select %7, %5, %9 : vector<8x64xi1>, vector<8x64xf32>
    %c0_7 = arith.constant 0 : index
    %c0_8 = arith.constant 0 : index
    %11 = vector.load %arg3[%c0_7, %c0_8] : memref<8x64xf32, #tpu.memory_space<vmem>>, vector<8x64xf32>
    %12 = arith.mulf %10, %11 : vector<8x64xf32>
    %c0_9 = arith.constant 0 : index
    %c0_10 = arith.constant 0 : index
    %13 = vector.load %arg12[%c0_9, %c0_10] : memref<64x64xf32, #tpu.memory_space<vmem>>, vector<64x64xf32>
    %c0_11 = arith.constant 0 : index
    %c0_12 = arith.constant 0 : index
    %14 = vector.load %arg13[%c0_11, %c0_12] : memref<1x64xf32, #tpu.memory_space<vmem>>, vector<1x64xf32>
    %cst_13 = arith.constant dense<0.000000e+00> : vector<8x64xf32>
    %15 = tpu.matmul %12, %13, %cst_13 {dimension_numbers = #tpu.dot_dimension_numbers<[1], [0], [0], [1], [0, 0, 1, 1], [], []>} : vector<8x64xf32>, vector<64x64xf32>, vector<8x64xf32> -> vector<8x64xf32>
    %16 = vector.broadcast %14 : vector<1x64xf32> to vector<8x64xf32>
    %17 = arith.addf %15, %16 : vector<8x64xf32>
    %cst_14 = arith.constant 0.000000e+00 : f32
    %18 = vector.broadcast %cst_14 : f32 to vector<8x64xf32>
    %19 = arith.cmpf oge, %17, %18 : vector<8x64xf32>
    %cst_15 = arith.constant 0.00999999977 : f32
    %20 = vector.broadcast %cst_15 : f32 to vector<8x64xf32>
    %21 = arith.mulf %20, %17 : vector<8x64xf32>
    %22 = arith.select %19, %17, %21 : vector<8x64xi1>, vector<8x64xf32>
    %c0_16 = arith.constant 0 : index
    %c0_17 = arith.constant 0 : index
    %23 = vector.load %arg4[%c0_16, %c0_17] : memref<8x64xf32, #tpu.memory_space<vmem>>, vector<8x64xf32>
    %24 = arith.mulf %22, %23 : vector<8x64xf32>
    %c0_18 = arith.constant 0 : index
    %c0_19 = arith.constant 0 : index
    %25 = vector.load %arg14[%c0_18, %c0_19] : memref<64x64xf32, #tpu.memory_space<vmem>>, vector<64x64xf32>
    %c0_20 = arith.constant 0 : index
    %c0_21 = arith.constant 0 : index
    %26 = vector.load %arg15[%c0_20, %c0_21] : memref<1x64xf32, #tpu.memory_space<vmem>>, vector<1x64xf32>
    %cst_22 = arith.constant dense<0.000000e+00> : vector<8x64xf32>
    %27 = tpu.matmul %24, %25, %cst_22 {dimension_numbers = #tpu.dot_dimension_numbers<[1], [0], [0], [1], [0, 0, 1, 1], [], []>} : vector<8x64xf32>, vector<64x64xf32>, vector<8x64xf32> -> vector<8x64xf32>
    %28 = vector.broadcast %26 : vector<1x64xf32> to vector<8x64xf32>
    %29 = arith.addf %27, %28 : vector<8x64xf32>
    %cst_23 = arith.constant 0.000000e+00 : f32
    %30 = vector.broadcast %cst_23 : f32 to vector<8x64xf32>
    %31 = arith.cmpf oge, %29, %30 : vector<8x64xf32>
    %cst_24 = arith.constant 0.00999999977 : f32
    %32 = vector.broadcast %cst_24 : f32 to vector<8x64xf32>
    %33 = arith.mulf %32, %29 : vector<8x64xf32>
    %34 = arith.select %31, %29, %33 : vector<8x64xi1>, vector<8x64xf32>
    %c0_25 = arith.constant 0 : index
    %c0_26 = arith.constant 0 : index
    %35 = vector.load %arg5[%c0_25, %c0_26] : memref<8x64xf32, #tpu.memory_space<vmem>>, vector<8x64xf32>
    %36 = arith.mulf %34, %35 : vector<8x64xf32>
    %c0_27 = arith.constant 0 : index
    %c0_28 = arith.constant 0 : index
    %37 = vector.load %arg16[%c0_27, %c0_28] : memref<64x32xf32, #tpu.memory_space<vmem>>, vector<64x32xf32>
    %c0_29 = arith.constant 0 : index
    %c0_30 = arith.constant 0 : index
    %38 = vector.load %arg17[%c0_29, %c0_30] : memref<1x32xf32, #tpu.memory_space<vmem>>, vector<1x32xf32>
    %cst_31 = arith.constant dense<0.000000e+00> : vector<8x32xf32>
    %39 = tpu.matmul %36, %37, %cst_31 {dimension_numbers = #tpu.dot_dimension_numbers<[1], [0], [0], [1], [0, 0, 1, 1], [], []>} : vector<8x64xf32>, vector<64x32xf32>, vector<8x32xf32> -> vector<8x32xf32>
    %40 = vector.broadcast %38 : vector<1x32xf32> to vector<8x32xf32>
    %41 = arith.addf %39, %40 : vector<8x32xf32>
    %cst_32 = arith.constant 0.000000e+00 : f32
    %42 = vector.broadcast %cst_32 : f32 to vector<8x32xf32>
    %43 = arith.cmpf oge, %41, %42 : vector<8x32xf32>
    %cst_33 = arith.constant 0.00999999977 : f32
    %44 = vector.broadcast %cst_33 : f32 to vector<8x32xf32>
    %45 = arith.mulf %44, %41 : vector<8x32xf32>
    %46 = arith.select %43, %41, %45 : vector<8x32xi1>, vector<8x32xf32>
    %c0_34 = arith.constant 0 : index
    %c0_35 = arith.constant 0 : index
    %47 = vector.load %arg6[%c0_34, %c0_35] : memref<8x32xf32, #tpu.memory_space<vmem>>, vector<8x32xf32>
    %48 = arith.mulf %46, %47 : vector<8x32xf32>
    %c0_36 = arith.constant 0 : index
    %c0_37 = arith.constant 0 : index
    %49 = vector.load %arg18[%c0_36, %c0_37] : memref<32x32xf32, #tpu.memory_space<vmem>>, vector<32x32xf32>
    %c0_38 = arith.constant 0 : index
    %c0_39 = arith.constant 0 : index
    %50 = vector.load %arg19[%c0_38, %c0_39] : memref<1x32xf32, #tpu.memory_space<vmem>>, vector<1x32xf32>
    %cst_40 = arith.constant dense<0.000000e+00> : vector<8x32xf32>
    %51 = tpu.matmul %48, %49, %cst_40 {dimension_numbers = #tpu.dot_dimension_numbers<[1], [0], [0], [1], [0, 0, 1, 1], [], []>} : vector<8x32xf32>, vector<32x32xf32>, vector<8x32xf32> -> vector<8x32xf32>
    %52 = vector.broadcast %50 : vector<1x32xf32> to vector<8x32xf32>
    %53 = arith.addf %51, %52 : vector<8x32xf32>
    %cst_41 = arith.constant 0.000000e+00 : f32
    %54 = vector.broadcast %cst_41 : f32 to vector<8x32xf32>
    %55 = arith.cmpf oge, %53, %54 : vector<8x32xf32>
    %cst_42 = arith.constant 0.00999999977 : f32
    %56 = vector.broadcast %cst_42 : f32 to vector<8x32xf32>
    %57 = arith.mulf %56, %53 : vector<8x32xf32>
    %58 = arith.select %55, %53, %57 : vector<8x32xi1>, vector<8x32xf32>
    %c0_43 = arith.constant 0 : index
    %c0_44 = arith.constant 0 : index
    %59 = vector.load %arg7[%c0_43, %c0_44] : memref<8x32xf32, #tpu.memory_space<vmem>>, vector<8x32xf32>
    %60 = arith.mulf %58, %59 : vector<8x32xf32>
    %c0_45 = arith.constant 0 : index
    %c0_46 = arith.constant 0 : index
    %61 = vector.load %arg20[%c0_45, %c0_46] : memref<32x32xf32, #tpu.memory_space<vmem>>, vector<32x32xf32>
    %c0_47 = arith.constant 0 : index
    %c0_48 = arith.constant 0 : index
    %62 = vector.load %arg21[%c0_47, %c0_48] : memref<1x32xf32, #tpu.memory_space<vmem>>, vector<1x32xf32>
    %cst_49 = arith.constant dense<0.000000e+00> : vector<8x32xf32>
    %63 = tpu.matmul %60, %61, %cst_49 {dimension_numbers = #tpu.dot_dimension_numbers<[1], [0], [0], [1], [0, 0, 1, 1], [], []>} : vector<8x32xf32>, vector<32x32xf32>, vector<8x32xf32> -> vector<8x32xf32>
    %64 = vector.broadcast %62 : vector<1x32xf32> to vector<8x32xf32>
    %65 = arith.addf %63, %64 : vector<8x32xf32>
    %cst_50 = arith.constant 0.000000e+00 : f32
    %66 = vector.broadcast %cst_50 : f32 to vector<8x32xf32>
    %67 = arith.cmpf oge, %65, %66 : vector<8x32xf32>
    %cst_51 = arith.constant 0.00999999977 : f32
    %68 = vector.broadcast %cst_51 : f32 to vector<8x32xf32>
    %69 = arith.mulf %68, %65 : vector<8x32xf32>
    %70 = arith.select %67, %65, %69 : vector<8x32xi1>, vector<8x32xf32>
    %c0_52 = arith.constant 0 : index
    %c0_53 = arith.constant 0 : index
    %71 = vector.load %arg8[%c0_52, %c0_53] : memref<8x32xf32, #tpu.memory_space<vmem>>, vector<8x32xf32>
    %72 = arith.mulf %70, %71 : vector<8x32xf32>
    %c0_54 = arith.constant 0 : index
    %c0_55 = arith.constant 0 : index
    %73 = vector.load %arg22[%c0_54, %c0_55] : memref<32x16xf32, #tpu.memory_space<vmem>>, vector<32x16xf32>
    %c0_56 = arith.constant 0 : index
    %c0_57 = arith.constant 0 : index
    %74 = vector.load %arg23[%c0_56, %c0_57] : memref<1x16xf32, #tpu.memory_space<vmem>>, vector<1x16xf32>
    %cst_58 = arith.constant dense<0.000000e+00> : vector<8x16xf32>
    %75 = tpu.matmul %72, %73, %cst_58 {dimension_numbers = #tpu.dot_dimension_numbers<[1], [0], [0], [1], [0, 0, 1, 1], [], []>} : vector<8x32xf32>, vector<32x16xf32>, vector<8x16xf32> -> vector<8x16xf32>
    %76 = vector.broadcast %74 : vector<1x16xf32> to vector<8x16xf32>
    %77 = arith.addf %75, %76 : vector<8x16xf32>
    %cst_59 = arith.constant 0.000000e+00 : f32
    %78 = vector.broadcast %cst_59 : f32 to vector<8x16xf32>
    %79 = arith.cmpf oge, %77, %78 : vector<8x16xf32>
    %cst_60 = arith.constant 0.00999999977 : f32
    %80 = vector.broadcast %cst_60 : f32 to vector<8x16xf32>
    %81 = arith.mulf %80, %77 : vector<8x16xf32>
    %82 = arith.select %79, %77, %81 : vector<8x16xi1>, vector<8x16xf32>
    %c0_61 = arith.constant 0 : index
    %c0_62 = arith.constant 0 : index
    %83 = vector.load %arg9[%c0_61, %c0_62] : memref<8x16xf32, #tpu.memory_space<vmem>>, vector<8x16xf32>
    %84 = arith.mulf %82, %83 : vector<8x16xf32>
    %c0_63 = arith.constant 0 : index
    %c0_64 = arith.constant 0 : index
    %85 = vector.load %arg24[%c0_63, %c0_64] : memref<16x3xf32, #tpu.memory_space<vmem>>, vector<16x3xf32>
    %c0_65 = arith.constant 0 : index
    %c0_66 = arith.constant 0 : index
    %86 = vector.load %arg25[%c0_65, %c0_66] : memref<1x3xf32, #tpu.memory_space<vmem>>, vector<1x3xf32>
    %cst_67 = arith.constant dense<0.000000e+00> : vector<8x3xf32>
    %87 = tpu.matmul %84, %85, %cst_67 {dimension_numbers = #tpu.dot_dimension_numbers<[1], [0], [0], [1], [0, 0, 1, 1], [], []>} : vector<8x16xf32>, vector<16x3xf32>, vector<8x3xf32> -> vector<8x3xf32>
    %88 = vector.broadcast %86 : vector<1x3xf32> to vector<8x3xf32>
    %89 = arith.addf %87, %88 : vector<8x3xf32>
    %90 = vector.extract_strided_slice %89 {offsets = [0, 0], sizes = [8, 1], strides = [1, 1]} : vector<8x3xf32> to vector<8x1xf32>
    %91 = vector.extract_strided_slice %89 {offsets = [0, 1], sizes = [8, 1], strides = [1, 1]} : vector<8x3xf32> to vector<8x1xf32>
    %92 = vector.extract_strided_slice %89 {offsets = [0, 2], sizes = [8, 1], strides = [1, 1]} : vector<8x3xf32> to vector<8x1xf32>
    %c0_68 = arith.constant 0 : index
    %c0_69 = arith.constant 0 : index
    %93 = vector.load %arg2[%c0_68, %c0_69] : memref<8x1xf32, #tpu.memory_space<vmem>>, vector<8x1xf32>
    %cst_70 = arith.constant 1.000000e-10 : f32
    %94 = vector.broadcast %cst_70 : f32 to vector<8x1xf32>
    %95 = arith.maximumf %93, %94 : vector<8x1xf32>
    %96 = math.log %95 : vector<8x1xf32>
    %97 = arith.mulf %91, %96 : vector<8x1xf32>
    %98 = math.exp %97 : vector<8x1xf32>
    %99 = arith.mulf %90, %98 : vector<8x1xf32>
    %100 = arith.addf %99, %92 : vector<8x1xf32>
    %c0_71 = arith.constant 0 : index
    %c0_72 = arith.constant 0 : index
    %101 = vector.load %arg26[%c0_71, %c0_72] : memref<8x1xf32, #tpu.memory_space<vmem>>, vector<8x1xf32>
    tpu.vector_store %arg26[%c0_71, %c0_72], %100 {strides = array<i32>} : memref<8x1xf32, #tpu.memory_space<vmem>>, vector<8x1xf32>,
    return
  }
  func.func @transform_0(%arg0: i32) -> (i32, i32) {
    %c0_i32 = arith.constant 0 : i32
    %c0_i32_0 = arith.constant 0 : i32
    return %arg0, %c0_i32 : i32, i32
  }
  func.func @transform_1(%arg0: i32) -> (i32, i32) {
    %c0_i32 = arith.constant 0 : i32
    %c0_i32_0 = arith.constant 0 : i32
    return %arg0, %c0_i32 : i32, i32
  }
  func.func @transform_2(%arg0: i32) -> (i32, i32) {
    %c0_i32 = arith.constant 0 : i32
    %c0_i32_0 = arith.constant 0 : i32
    return %arg0, %c0_i32 : i32, i32
  }
  func.func @transform_3(%arg0: i32) -> (i32, i32) {
    %c0_i32 = arith.constant 0 : i32
    %c0_i32_0 = arith.constant 0 : i32
    return %arg0, %c0_i32 : i32, i32
  }
  func.func @transform_4(%arg0: i32) -> (i32, i32) {
    %c0_i32 = arith.constant 0 : i32
    %c0_i32_0 = arith.constant 0 : i32
    return %arg0, %c0_i32 : i32, i32
  }
  func.func @transform_5(%arg0: i32) -> (i32, i32) {
    %c0_i32 = arith.constant 0 : i32
    %c0_i32_0 = arith.constant 0 : i32
    return %arg0, %c0_i32 : i32, i32
  }
  func.func @transform_6(%arg0: i32) -> (i32, i32) {
    %c0_i32 = arith.constant 0 : i32
    %c0_i32_0 = arith.constant 0 : i32
    return %arg0, %c0_i32 : i32, i32
  }
  func.func @transform_7(%arg0: i32) -> (i32, i32) {
    %c0_i32 = arith.constant 0 : i32
    %c0_i32_0 = arith.constant 0 : i32
    return %arg0, %c0_i32 : i32, i32
  }
  func.func @transform_8(%arg0: i32) -> (i32, i32) {
    %c0_i32 = arith.constant 0 : i32
    %c0_i32_0 = arith.constant 0 : i32
    return %arg0, %c0_i32 : i32, i32
  }
  func.func @transform_9(%arg0: i32) -> (i32, i32) {
    %c0_i32 = arith.constant 0 : i32
    %c0_i32_0 = arith.constant 0 : i32
    %c0_i32_1 = arith.constant 0 : i32
    return %c0_i32, %c0_i32_0 : i32, i32
  }
  func.func @transform_10(%arg0: i32) -> (i32, i32) {
    %c0_i32 = arith.constant 0 : i32
    %c0_i32_0 = arith.constant 0 : i32
    %c0_i32_1 = arith.constant 0 : i32
    return %c0_i32, %c0_i32_0 : i32, i32
  }
  func.func @transform_11(%arg0: i32) -> (i32, i32) {
    %c0_i32 = arith.constant 0 : i32
    %c0_i32_0 = arith.constant 0 : i32
    %c0_i32_1 = arith.constant 0 : i32
    return %c0_i32, %c0_i32_0 : i32, i32
  }
  func.func @transform_12(%arg0: i32) -> (i32, i32) {
    %c0_i32 = arith.constant 0 : i32
    %c0_i32_0 = arith.constant 0 : i32
    %c0_i32_1 = arith.constant 0 : i32
    return %c0_i32, %c0_i32_0 : i32, i32
  }
  func.func @transform_13(%arg0: i32) -> (i32, i32) {
    %c0_i32 = arith.constant 0 : i32
    %c0_i32_0 = arith.constant 0 : i32
    %c0_i32_1 = arith.constant 0 : i32
    return %c0_i32, %c0_i32_0 : i32, i32
  }
  func.func @transform_14(%arg0: i32) -> (i32, i32) {
    %c0_i32 = arith.constant 0 : i32
    %c0_i32_0 = arith.constant 0 : i32
    %c0_i32_1 = arith.constant 0 : i32
    return %c0_i32, %c0_i32_0 : i32, i32
  }
  func.func @transform_15(%arg0: i32) -> (i32, i32) {
    %c0_i32 = arith.constant 0 : i32
    %c0_i32_0 = arith.constant 0 : i32
    %c0_i32_1 = arith.constant 0 : i32
    return %c0_i32, %c0_i32_0 : i32, i32
  }
  func.func @transform_16(%arg0: i32) -> (i32, i32) {
    %c0_i32 = arith.constant 0 : i32
    %c0_i32_0 = arith.constant 0 : i32
    %c0_i32_1 = arith.constant 0 : i32
    return %c0_i32, %c0_i32_0 : i32, i32
  }
  func.func @transform_17(%arg0: i32) -> (i32, i32) {
    %c0_i32 = arith.constant 0 : i32
    %c0_i32_0 = arith.constant 0 : i32
    %c0_i32_1 = arith.constant 0 : i32
    return %c0_i32, %c0_i32_0 : i32, i32
  }
  func.func @transform_18(%arg0: i32) -> (i32, i32) {
    %c0_i32 = arith.constant 0 : i32
    %c0_i32_0 = arith.constant 0 : i32
    %c0_i32_1 = arith.constant 0 : i32
    return %c0_i32, %c0_i32_0 : i32, i32
  }
  func.func @transform_19(%arg0: i32) -> (i32, i32) {
    %c0_i32 = arith.constant 0 : i32
    %c0_i32_0 = arith.constant 0 : i32
    %c0_i32_1 = arith.constant 0 : i32
    return %c0_i32, %c0_i32_0 : i32, i32
  }
  func.func @transform_20(%arg0: i32) -> (i32, i32) {
    %c0_i32 = arith.constant 0 : i32
    %c0_i32_0 = arith.constant 0 : i32
    %c0_i32_1 = arith.constant 0 : i32
    return %c0_i32, %c0_i32_0 : i32, i32
  }
  func.func @transform_21(%arg0: i32) -> (i32, i32) {
    %c0_i32 = arith.constant 0 : i32
    %c0_i32_0 = arith.constant 0 : i32
    %c0_i32_1 = arith.constant 0 : i32
    return %c0_i32, %c0_i32_0 : i32, i32
  }
  func.func @transform_22(%arg0: i32) -> (i32, i32) {
    %c0_i32 = arith.constant 0 : i32
    %c0_i32_0 = arith.constant 0 : i32
    %c0_i32_1 = arith.constant 0 : i32
    return %c0_i32, %c0_i32_0 : i32, i32
  }
  func.func @transform_23(%arg0: i32) -> (i32, i32) {
    %c0_i32 = arith.constant 0 : i32
    %c0_i32_0 = arith.constant 0 : i32
    %c0_i32_1 = arith.constant 0 : i32
    return %c0_i32, %c0_i32_0 : i32, i32
  }
  func.func @transform_24(%arg0: i32) -> (i32, i32) {
    %c0_i32 = arith.constant 0 : i32
    %c0_i32_0 = arith.constant 0 : i32
    %c0_i32_1 = arith.constant 0 : i32
    return %c0_i32, %c0_i32_0 : i32, i32
  }
  func.func @transform_25(%arg0: i32) -> (i32, i32) {
    %c0_i32 = arith.constant 0 : i32
    %c0_i32_0 = arith.constant 0 : i32
    return %arg0, %c0_i32 : i32, i32
  }
}

</mosaic_0001>

<bundles_post_ra>
// kernel: tpu_custom_call.1
= control target key start
LH: loop header
LB: loop body
LE: loop exit
PB: predicated region body
PF: predicated region fallthrough
CT: control target
= control target key end

     0   :  { %s1103_s0 = inlined_call_operand.hbm [shape: f32[8,19], index: 0, kind: input, shape index: {}]   ;;  %s1104_s1 = inlined_call_operand.vmem [shape: f32[8,1], index: 1, kind: input, shape index: {}]   ;;  %s1105_s2 = inlined_call_operand.hbm [shape: f32[8,64], index: 2, kind: input, shape index: {}]   ;;  %s1106_s3 = inlined_call_operand.hbm [shape: f32[8,64], index: 3, kind: input, shape index: {}]   ;;  %s1107_s4 = inlined_call_operand.hbm [shape: f32[8,64], index: 4, kind: input, shape index: {}]   ;;  %s1108_s5 = inlined_call_operand.hbm [shape: f32[8,32], index: 5, kind: input, shape index: {}]   ;;  %s1109_s6 = inlined_call_operand.hbm [shape: f32[8,32], index: 6, kind: input, shape index: {}]   ;;  %s1110_s7 = inlined_call_operand.hbm [shape: f32[8,32], index: 7, kind: input, shape index: {}]   ;;  %s1111_s8 = inlined_call_operand.vmem [shape: f32[8,16], index: 8, kind: input, shape index: {}]   ;;  %s1112_s9 = inlined_call_operand.vmem [shape: f32[19,64], index: 9, kind: input, shape index: {}]   ;;  %s1113_s10 = inlined_call_operand.vmem [shape: f32[1,64], index: 10, kind: input, shape index: {}]   ;;  %s1114_s11 = inlined_call_operand.vmem [shape: f32[64,64], index: 11, kind: input, shape index: {}]   ;;  %s1115_s12 = inlined_call_operand.vmem [shape: f32[1,64], index: 12, kind: input, shape index: {}]   ;;  %s1116_s13 = inlined_call_operand.hbm [shape: f32[64,64], index: 13, kind: input, shape index: {}]   ;;  %s1117_s14 = inlined_call_operand.vmem [shape: f32[1,64], index: 14, kind: input, shape index: {}]   ;;  %s1118_s15 = inlined_call_operand.vmem [shape: f32[64,32], index: 15, kind: input, shape index: {}]   ;;  %s1119_s16 = inlined_call_operand.vmem [shape: f32[1,32], index: 16, kind: input, shape index: {}]   ;;  %s1120_s17 = inlined_call_operand.vmem [shape: f32[32,32], index: 17, kind: input, shape index: {}]   ;;  %s1121_s18 = inlined_call_operand.vmem [shape: f32[1,32], index: 18, kind: input, shape index: {}]   ;;  %s1122_s19 = inlined_call_operand.hbm [shape: f32[32,32], index: 19, kind: input, shape index: {}]   ;;  %s1123_s20 = inlined_call_operand.vmem [shape: f32[1,32], index: 20, kind: input, shape index: {}]   ;;  %s1124_s21 = inlined_call_operand.vmem [shape: f32[32,16], index: 21, kind: input, shape index: {}]   ;;  %s1125_s22 = inlined_call_operand.vmem [shape: f32[1,16], index: 22, kind: input, shape index: {}]   ;;  %s1126_s23 = inlined_call_operand.vmem [shape: f32[16,3], index: 23, kind: input, shape index: {}]   ;;  %s1127_s24 = inlined_call_operand.vmem [shape: f32[1,3], index: 24, kind: input, shape index: {}]   ;;  %s1128_s25 = inlined_call_operand.vmem [shape: f32[8,1], index: 25, kind: output, shape index: {}]  }
   0x1   :  { %1131 = sst [smem:[#allocation21_spill]] %s1103_s0 }
   0x2   :  { %1132 = sst [smem:[#allocation22_spill]] %s1104_s1 }
   0x3   :  { %1133 = sst [smem:[#allocation23_spill]] %s1105_s2 }
   0x4   :  { %1134 = sst [smem:[#allocation24_spill]] %s1106_s3 }
   0x5   :  { %1135 = sst [smem:[#allocation25_spill]] %s1107_s4 }
   0x6   :  { %1136 = sst [smem:[#allocation26_spill]] %s1108_s5 }
   0x7   :  { %1137 = sst [smem:[#allocation27_spill]] %s1109_s6 }
   0x8   :  { %1138 = sst [smem:[#allocation28_spill]] %s1110_s7 }
   0x9   :  { %1139 = sst [smem:[#allocation29_spill]] %s1111_s8 }
   0xa   :  { %1140 = sst [smem:[#allocation30_spill]] %s1112_s9 }
   0xb   :  { %1141 = sst [smem:[#allocation31_spill]] %s1125_s22 }
   0xc   :  { %1142 = sst [smem:[#allocation32_spill]] %s1127_s24 }
   0xd   :  { %1143 = sst [smem:[#allocation33_spill]] %s1128_s25 }
   0xe   :  { %30 = vsyncpa [#allocation3], 0 }
   0xf   :  { %31 = vsyncpa [#allocation5], 0 }
  0x10   :  { %32 = vsyncpa [#allocation8], 0 }
  0x11   :  { %33 = vsyncpa [#allocation11], 0  ;;  %s1144_s6 = sld [smem:[#allocation23_spill]] }
  0x17   :  { %s53_s30 = sshll.u32 %s1144_s6, 4  ;;  %s54_s30 = int_to_ptr.hbm [resolvable:$true] %s53_s30 }
  0x18   :  { %34 = vsyncpa [#allocation14], 0  ;;  %s800_s7 = smov [#allocation4]   ;;  %s1145_s8 = sld [smem:[#allocation25_spill]] }
  0x19   :  { %s55_s3 = sshll.u32 %s800_s7, 4  ;;  %s801_s4 = smov [#allocation7]   ;;  %s56_s3 = int_to_ptr.vmem [resolvable:$true] %s55_s3 }
  0x1a   :  { %58 = dma.hbm_to_vmem [thread:$0]  %s54_s30, 128, %s56_s3, [#allocation5]  }
  0x1b   :  { %s77_s28 = sshll.u32 %s801_s4, 4  ;;  %s1146_s0 = sld [smem:[#allocation27_spill]]  ;;  %s78_s28 = int_to_ptr.vmem [resolvable:$true] %s77_s28 }
  0x1c   :  { %s128_s6 = sshll.u32 %s1116_s13, 4  ;;  %s802_s7 = smov [#allocation10]   ;;  %s129_s6 = int_to_ptr.hbm [resolvable:$true] %s128_s6 }
  0x1d   :  { %s99_s24 = sshll.u32 %s802_s7, 4  ;;  %s803_s30 = smov [#allocation13]   ;;  %s100_s24 = int_to_ptr.vmem [resolvable:$true] %s99_s24 }
  0x1e   :  { %s75_s27 = sshll.u32 %s1145_s8, 4  ;;  %s130_s3 = sshll.u32 %s803_s30, 4  ;;  %s76_s27 = int_to_ptr.hbm [resolvable:$true] %s75_s27  ;;  %s131_s3 = int_to_ptr.vmem [resolvable:$true] %s130_s3 }
  0x1f   :  { %80 = dma.hbm_to_vmem [thread:$0]  %s76_s27, 128, %s78_s28, [#allocation8]  }
  0x20   :  { %s1130_s26 = smov 128   ;;  %s805_s1 = smov 8  }
  0x21   :  { %s97_s25 = sshll.u32 %s1146_s0, 4  ;;  %s1147_s4 = sld [smem:[#allocation21_spill]]  ;;  %s98_s25 = int_to_ptr.hbm [resolvable:$true] %s97_s25 }
  0x22   :  { %102 = dma.hbm_to_vmem [thread:$0]  %s98_s25, 128, %s100_s24, [#allocation11]  }
  0x23   :  { %136 = dma.hbm_to_vmem [thread:$0]  %s129_s6, 1024, %s131_s3, [#allocation14], %s1130_s26, %s1130_s26, %s805_s1  }
  0x24   :  { %s806_s13 = smov [#allocation2]   ;;  %s1148_s24 = sld [smem:[#allocation24_spill]] }
  0x25   :  { %s42_s9 = sshll.u32 %s806_s13, 4  ;;  %s807_s29 = smov [#allocation6]   ;;  %s43_s9 = int_to_ptr.vmem [resolvable:$true] %s42_s9 }
  0x26   :  { %s66_s2 = sshll.u32 %s807_s29, 4  ;;  %s1149_s22 = sld [smem:[#allocation26_spill]]  ;;  %s67_s2 = int_to_ptr.vmem [resolvable:$true] %s66_s2 }
  0x27   :  { %s40_s28 = sshll.u32 %s1147_s4, 4  ;;  %s1150_s27 = sld [smem:[#allocation28_spill]]  ;;  %s41_s28 = int_to_ptr.hbm [resolvable:$true] %s40_s28 }
  0x28   :  { %45 = dma.hbm_to_vmem [thread:$0]  %s41_s28, 128, %s43_s9, [#allocation3]  }
  0x29   :  { %s808_s13 = smov [#allocation9]   ;;  %s809_s28 = smov [#allocation12]  }
  0x2a   :  { %s64_s25 = sshll.u32 %s1148_s24, 4  ;;  %s88_s26 = sshll.u32 %s808_s13, 4  ;;  %s65_s25 = int_to_ptr.hbm [resolvable:$true] %s64_s25  ;;  %s89_s26 = int_to_ptr.vmem [resolvable:$true] %s88_s26 }
  0x2b   :  { %69 = dma.hbm_to_vmem [thread:$0]  %s65_s25, 128, %s67_s2, [#allocation5]  }
  0x2c   :  { %s86_s6 = sshll.u32 %s1149_s22, 4  ;;  %s110_s9 = sshll.u32 %s809_s28, 4  ;;  %s87_s6 = int_to_ptr.hbm [resolvable:$true] %s86_s6  ;;  %s111_s9 = int_to_ptr.vmem [resolvable:$true] %s110_s9 }
  0x2d   :  { %s108_s4 = sshll.u32 %s1150_s27, 4  ;;  %s151_s24 = sshll.u32 %s1122_s19, 4  ;;  %s109_s4 = int_to_ptr.hbm [resolvable:$true] %s108_s4  ;;  %s152_s24 = int_to_ptr.hbm [resolvable:$true] %s151_s24 }
  0x2e   :  { %91 = dma.hbm_to_vmem [thread:$0]  %s87_s6, 128, %s89_s26, [#allocation8]  }
  0x2f   :  { %113 = dma.hbm_to_vmem [thread:$0]  %s109_s4, 128, %s111_s9, [#allocation11]  }
  0x30   :  { %s810_s22 = smov [#allocation15]   ;;  %s1151_s29 = smov 128  }
  0x31   :  { %s153_s25 = sshll.u32 %s810_s22, 4  ;;  %s154_s25 = int_to_ptr.vmem [resolvable:$true] %s153_s25 }
  0x32   :  { %159 = dma.hbm_to_vmem [thread:$0]  %s152_s24, 512, %s154_s25, [#allocation14], %s1151_s29, %s1151_s29, %s805_s1  }
  0x33   :  { %790 = dma.done.wait [#allocation3], 128  }
  0x34   :  { %791 = vsyncadd [#allocation3], 4294967168 }
  0x35   :  { %792 = dma.done.wait [#allocation5], 256  }
  0x36   :  { %793 = vsyncadd [#allocation5], 4294967040 }
  0x37   :  { %794 = dma.done.wait [#allocation8], 256  }
  0x38   :  { %795 = vsyncadd [#allocation8], 4294967040 }
  0x39   :  { %796 = dma.done.wait [#allocation11], 256  }
  0x3a   :  { %797 = vsyncadd [#allocation11], 4294967040 }
  0x3b   :  { %798 = dma.done.wait [#allocation14], 1536  }
  0x3c   :  { %799 = vsyncadd [#allocation14], 4294965760  ;;  %vm218_vm0 = vcmask 1042432   ;;  %s1152_s2 = sld [smem:[#allocation30_spill]]  ;;  %v254_v2 = vld [vmem:[%s1114_s11 + $0x38] sm:$0xff]  ;;  %v253_v3 = vld [vmem:[%s1114_s11 + $0x30] sm:$0xff] }
  0x3d   :  { %v206_v5 = vld [vmem:[#allocation2] sm:$0xff]  ;;  %271 = vmatpush.msra.mxu1 %v254_v2  ;;  %vm214_vm1 = vcmask 154624   ;;  %v252_v6 = vld [vmem:[%s1114_s11 + $0x28] sm:$0xff]  ;;  %v250_v8 = vld [vmem:[%s1114_s11 + $0x18] sm:$0xff]  ;;  %vm259_vm3 = vcmask 523264   ;;  %vm376_vm7 = vcmask 261120  }
  0x3e   :  { %v251_v7 = vld [vmem:[%s1114_s11 + $0x20] sm:$0xff]  ;;  %v249_v9 = vld [vmem:[%s1114_s11 + $0x10] sm:$0xff]  ;;  %v248_v10 = vld [vmem:[%s1114_s11 + $0x8] sm:$0xff]  ;;  %s1153_s19 = sld [smem:[#allocation22_spill]]  ;;  %s811_s26 = smov 1   ;;  %vm483_vm11 = vcmask 130048  }
  0x3f   :  { %272 = vmatpush.msra.mxu1 %v253_v3  ;;  %v247_v11 = vld [vmem:[%s1114_s11] sm:$0xff]  ;;  %v295_v12 = vld [vmem:[#allocation13 + $0x38] sm:$0xff]  ;;  %v294_v13 = vld [vmem:[#allocation13 + $0x30] sm:$0xff]  ;;  %s1156_s1 = sld [smem:[#allocation32_spill]]  ;;  %s812_s6 = smov 126   ;;  %vm528_vm12 = vcmask 7168  }
  0x40   :  { %311 = vmatpush.msra.mxu2 %v295_v12  ;;  %v293_v14 = vld [vmem:[#allocation13 + $0x28] sm:$0xff]  ;;  %v292_v15 = vld [vmem:[#allocation13 + $0x20] sm:$0xff]  ;;  %v245_v20 = vld [vmem:[#allocation4] sm:$0xff]  ;;  %s813_s3 = smov 127   ;;  %s1157_s8 = sld [smem:[#allocation33_spill]] }
  0x41   :  { %273 = vmatpush.msra.mxu1 %v252_v6  ;;  %v562_v16 = vld [vmem:[%s1113_s10] ss:$0 sm:$0xff]  ;;  %v291_v23 = vld [vmem:[#allocation13 + $0x18] sm:$0xff]  ;;  %v290_v24 = vld [vmem:[#allocation13 + $0x10] sm:$0xff] }
  0x42   :  { %v209_v0 = vld [vmem:[%s1152_s2 + $0x10] sm:$0x7]  ;;  %v208_v1 = vld [vmem:[%s1152_s2 + $0x8] sm:$0xff]  ;;  %v207_v4 = vld [vmem:[%s1152_s2] sm:$0xff]  ;;  %312 = vmatpush.msra.mxu2 %v294_v13 }
  0x43   :  { %539 = vmatpush.msk.msra.mxu0 %vm218_vm0, %v209_v0  ;;  %274 = vmatpush.msra.mxu1 %v251_v7  ;;  %v289_v25 = vld [vmem:[#allocation13 + $0x8] sm:$0xff]  ;;  %v288_v26 = vld [vmem:[#allocation13] sm:$0xff]  ;;  %v334_v28 = vld [vmem:[%s1118_s15 + $0x30] sm:$0xff] }
  0x44   :  { %313 = vmatpush.msra.mxu2 %v293_v14  ;;  %v335_v27 = vld [vmem:[%s1118_s15 + $0x38] sm:$0xff]  ;;  %v333_v29 = vld [vmem:[%s1118_s15 + $0x28] sm:$0xff]  ;;  %v332_v30 = vld [vmem:[%s1118_s15 + $0x20] sm:$0xff] }
  0x45   :  { %236 = vmatpush.msra.mxu0 %v208_v1  ;;  %275 = vmatpush.msra.mxu1 %v250_v8  ;;  %v563_v31 = vld [vmem:[%s1115_s12] ss:$0 sm:$0xff]  ;;  %v286_v35 = vld [vmem:[#allocation6] sm:$0xff]  ;;  %v331_v38 = vld [vmem:[%s1118_s15 + $0x18] sm:$0xff] }
  0x46   :  { %314 = vmatpush.msra.mxu2 %v292_v15  ;;  %351 = vmatpush.msra.mxu3 %v335_v27  ;;  %v330_v39 = vld [vmem:[%s1118_s15 + $0x10] sm:$0xff]  ;;  %v329_v40 = vld [vmem:[%s1118_s15 + $0x8] sm:$0xff]  ;;  %v328_v41 = vld [vmem:[%s1118_s15] sm:$0xff]  ;;  %s1154_s15 = sld [smem:[#allocation31_spill]] }
  0x47   :  { %237 = vmatpush.msra.mxu0 %v207_v4  ;;  %276 = vmatpush.msra.mxu1 %v249_v9  ;;  %v564_v42 = vld [vmem:[%s1117_s14] ss:$0 sm:$0xff]  ;;  %v326_v46 = vld [vmem:[#allocation7] sm:$0xff]  ;;  %v370_v50 = vld [vmem:[%s1120_s17 + $0x10] sm:$0xff]  ;;  %s1155_s14 = sld [smem:[#allocation29_spill]] }
  0x48   :  { %540 = vmatmul.msk.f32.vlgmr.msra.gmra.mxu0 %vm214_vm1, %v206_v5  ;;  %315 = vmatpush.msra.mxu2 %v291_v23  ;;  %v371_v49 = vld [vmem:[%s1120_s17 + $0x18] sm:$0xff]  ;;  %v369_v51 = vld [vmem:[%s1120_s17 + $0x8] sm:$0xff]  ;;  %v368_v52 = vld [vmem:[%s1120_s17] sm:$0xff] }
  0x49   :  { %277 = vmatpush.msra.mxu1 %v248_v10  ;;  %352 = vmatpush.msra.mxu3 %v334_v28  ;;  %v565_v53 = vld [vmem:[%s1119_s16] ss:$0 sm:$0xff]  ;;  %v408_v60 = vld [vmem:[#allocation15 + $0x18] sm:$0xff]  ;;  %v407_v61 = vld [vmem:[#allocation15 + $0x10] sm:$0xff] }
  0x4a   :  { %316 = vmatpush.msra.mxu2 %v290_v24  ;;  %392 = vmatpush.msrb.mxu0 %v371_v49  ;;  %v366_v57 = vld [vmem:[#allocation9] sm:$0xff]  ;;  %v405_v63 = vld [vmem:[#allocation15] sm:$0xff]  ;;  %v403_v4 = vld [vmem:[#allocation10] sm:$0xff] }
  0x4b   :  { %278 = vmatpush.msra.mxu1 %v247_v11  ;;  %353 = vmatpush.msra.mxu3 %v333_v29  ;;  %v406_v62 = vld [vmem:[#allocation15 + $0x8] sm:$0xff]  ;;  %v444_v7 = vld [vmem:[%s1124_s21 + $0x18] sm:$0xff]  ;;  %v443_v8 = vld [vmem:[%s1124_s21 + $0x10] sm:$0xff] }
  0x4c   :  { %317 = vmatpush.msra.mxu2 %v289_v25  ;;  %393 = vmatpush.msrb.mxu0 %v370_v50  ;;  %v566_v0 = vld [vmem:[%s1121_s18] ss:$0 sm:$0xff]  ;;  %v442_v9 = vld [vmem:[%s1124_s21 + $0x8] sm:$0xff]  ;;  %v439_v15 = vld [vmem:[#allocation12] sm:$0xff] }
  0x4d   :  { %354 = vmatpush.msra.mxu3 %v332_v30  ;;  %464 = vmatpush.msrb.mxu1 %v444_v7  ;;  %v441_v10 = vld [vmem:[%s1124_s21] sm:$0xff] }
  0x4e   :  { %318 = vmatpush.msra.mxu2 %v288_v26  ;;  %394 = vmatpush.msrb.mxu0 %v369_v51  ;;  %v567_v11 = vld [vmem:[%s1123_s20] ss:$0 sm:$0xff] }
  0x4f   :  { %355 = vmatpush.msra.mxu3 %v331_v38  ;;  %465 = vmatpush.msrb.mxu1 %v443_v8  ;;  %v568_v24 = vld [vmem:[%s1154_s15] ss:$0 sm:$0xff] }
  0x50   :  { %395 = vmatpush.msrb.mxu0 %v368_v52  ;;  %v475_v28 = vld [vmem:[%s1155_s14] sm:$0xff] }
  0x51   :  { %356 = vmatpush.msra.mxu3 %v330_v39  ;;  %466 = vmatpush.msrb.mxu1 %v442_v9 }
  0x52   :  { %428 = vmatpush.msra.mxu0 %v408_v60 }
  0x53   :  { %357 = vmatpush.msra.mxu3 %v329_v40  ;;  %467 = vmatpush.msrb.mxu1 %v441_v10 }
  0x54   :  { %429 = vmatpush.msra.mxu0 %v407_v61 }
  0x55   :  { %358 = vmatpush.msra.mxu3 %v328_v41 }
  0x56   :  { %430 = vmatpush.msra.mxu0 %v406_v62 }
  0x58   :  { %431 = vmatpush.msra.mxu0 %v405_v63 }
  0xc5   :  { %v239_v17 = vpop.f32.mrf.mxu0 }
  0xc6   :  { %v240_v18 = vadd.f32 %v562_v16, %v239_v17 }
  0xc8   :  { %vm242_vm2 = vcmp.ge.f32.partialorder %v240_v18, 0.0  ;;  %v243_v19 = vmul.f32 0.01, %v240_v18 }
  0xca   :  { %v244_v21 = vsel %vm242_vm2, %v240_v18, %v243_v19  ;;  %v478_v18 = vld [vmem:[%s1126_s23 + $0x8] sm:$0xff]  ;;  %v477_v19 = vld [vmem:[%s1126_s23] sm:$0xff] }
  0xcb   :  { %v246_v22 = vmul.f32 %v245_v20, %v244_v21  ;;  %501 = vmatpush.msrb.mxu2 %v478_v18  ;;  %v507_v20 = vld [vmem:[%s1153_s19] sm:$0xff] }
  0xcc   :  { %v508_v21 = vmax.f32 %v507_v20, 1e-10 }
  0xcd   :  { %541 = vmatmul.msk.f32.vlgmr.msra.gmra.mxu1 %vm259_vm3, %v246_v22  ;;  %502 = vmatpush.msrb.mxu2 %v477_v19 }
  0xce   :  { %570 = vlog2.f32 %v508_v21 }
  0xd4   :  { %v571_v22 = vpop.eup %570 }
  0xd5   :  { %v510_v23 = vmul.f32 0.6931472, %v571_v22 }
  0xd7   :  { %512 = vrot.lane.b32.xlu0 %v510_v23, %s811_s26 }
 0x14a   :  { %v280_v32 = vpop.f32.mrf.mxu1 }
 0x14b   :  { %v281_v33 = vadd.f32 %v563_v31, %v280_v32  ;;  %v569_v31 = vld [vmem:[%s1156_s1] ss:$0 sm:$0xff] }
 0x14d   :  { %vm283_vm4 = vcmp.ge.f32.partialorder %v281_v33, 0.0  ;;  %v284_v34 = vmul.f32 0.01, %v281_v33 }
 0x14f   :  { %v285_v36 = vsel %vm283_vm4, %v281_v33, %v284_v34  ;;  %v513_v33 = vpop.permute.xlu0 %512 }
 0x150   :  { %v287_v37 = vmul.f32 %v286_v35, %v285_v36 }
 0x152   :  { %542 = vmatmul.msk.f32.vlgmr.msra.gmra.mxu2 %vm259_vm3, %v287_v37 }
 0x1d5   :  { %v320_v43 = vpop.f32.mrf.mxu2 }
 0x1d6   :  { %v321_v44 = vadd.f32 %v564_v42, %v320_v43 }
 0x1d8   :  { %vm323_vm5 = vcmp.ge.f32.partialorder %v321_v44, 0.0  ;;  %v324_v45 = vmul.f32 0.01, %v321_v44 }
 0x1da   :  { %v325_v47 = vsel %vm323_vm5, %v321_v44, %v324_v45 }
 0x1db   :  { %v327_v48 = vmul.f32 %v326_v46, %v325_v47 }
 0x1dd   :  { %543 = vmatmul.msk.f32.vlgmr.msra.gmra.mxu3 %vm259_vm3, %v327_v48 }
 0x260   :  { %v360_v54 = vpop.f32.mrf.mxu3 }
 0x261   :  { %v361_v55 = vadd.f32 %v565_v53, %v360_v54 }
 0x263   :  { %vm363_vm6 = vcmp.ge.f32.partialorder %v361_v55, 0.0  ;;  %v364_v56 = vmul.f32 0.01, %v361_v55 }
 0x265   :  { %v365_v58 = vsel %vm363_vm6, %v361_v55, %v364_v56 }
 0x266   :  { %v367_v59 = vmul.f32 %v366_v57, %v365_v58 }
 0x268   :  { %544 = vmatmul.msk.f32.vlgmr.msrb.gmra.mxu0 %vm376_vm7, %v367_v59 }
 0x2e5   :  { %v397_v1 = vpop.f32.mrf.mxu0 }
 0x2e6   :  { %v398_v2 = vadd.f32 %v566_v0, %v397_v1 }
 0x2e8   :  { %vm400_vm8 = vcmp.ge.f32.partialorder %v398_v2, 0.0  ;;  %v401_v3 = vmul.f32 0.01, %v398_v2 }
 0x2ea   :  { %v402_v5 = vsel %vm400_vm8, %v398_v2, %v401_v3 }
 0x2eb   :  { %v404_v6 = vmul.f32 %v403_v4, %v402_v5 }
 0x2ed   :  { %545 = vmatmul.msk.f32.vlgmr.msra.gmra.mxu0 %vm376_vm7, %v404_v6 }
 0x36a   :  { %v433_v12 = vpop.f32.mrf.mxu0 }
 0x36b   :  { %v434_v13 = vadd.f32 %v567_v11, %v433_v12 }
 0x36d   :  { %vm436_vm9 = vcmp.ge.f32.partialorder %v434_v13, 0.0  ;;  %v437_v14 = vmul.f32 0.01, %v434_v13 }
 0x36f   :  { %v438_v16 = vsel %vm436_vm9, %v434_v13, %v437_v14 }
 0x370   :  { %v440_v17 = vmul.f32 %v439_v15, %v438_v16 }
 0x372   :  { %546 = vmatmul.msk.f32.vlgmr.msrb.gmra.mxu1 %vm376_vm7, %v440_v17 }
 0x3ef   :  { %v469_v25 = vpop.f32.mrf.mxu1 }
 0x3f0   :  { %v470_v26 = vadd.f32 %v568_v24, %v469_v25 }
 0x3f2   :  { %vm472_vm10 = vcmp.ge.f32.partialorder %v470_v26, 0.0  ;;  %v473_v27 = vmul.f32 0.01, %v470_v26 }
 0x3f4   :  { %v474_v29 = vsel %vm472_vm10, %v470_v26, %v473_v27 }
 0x3f5   :  { %v476_v30 = vmul.f32 %v475_v28, %v474_v29 }
 0x3f7   :  { %547 = vmatmul.msk.f32.vlgmr.msrb.gmra.mxu2 %vm483_vm11, %v476_v30 }
 0x47a   :  { %v504_v32 = vpop.f32.mrf.mxu2 }
 0x47b   :  { %v505_v34 = vadd.f32 %v569_v31, %v504_v32 }
 0x47d   :  { %v515_v35 = vmul.f32 %v513_v33, %v505_v34  ;;  %524 = vrot.lane.b32.xlu1 %v505_v34, %s812_s6 }
 0x47f   :  { %v516_v36 = vmul.f32 1.442695, %v515_v35 }
 0x481   :  { %572 = vpow2.f32 %v516_v36 }
 0x487   :  { %v573_v37 = vpop.eup %572 }
 0x488   :  { %519 = vrot.lane.b32.xlu0 %v573_v37, %s813_s3 }
 0x4ef   :  { %v525_v40 = vpop.permute.xlu1 %524 }
 0x4fa   :  { %v520_v38 = vpop.permute.xlu0 %519 }
 0x4fb   :  { %v522_v39 = vmul.f32 %v520_v38, %v505_v34 }
 0x4fd   :  { %v527_v41 = vadd.f32 %v525_v40, %v522_v39 }
 0x4ff   :  { %529 = vst.msk [vmem:[%s1157_s8] sm:$0xff] %vm528_vm12, %v527_v41 }
 0x500   :  { %534 = vsyncpa [#allocation3], 1 }
 0x501   :  { %535 = vsyncpa [#allocation5], 1 }
 0x502   :  { %536 = vsyncpa [#allocation8], 1 }
 0x503   :  { %537 = vsyncpa [#allocation11], 1 }
 0x504   :  { %538 = vsyncpa [#allocation14], 1 }

</bundles_post_ra>
